<compile_context>
chip_gen: v5e
topology: v5e:2x2
jax: 0.10.0
libtpu: 0.0.40
codegen_flags: <defaults>
</compile_context>

<pallas_src>
import math
from functools import lru_cache, partial

import numpy as np
import jax
import jax.numpy as jnp
from jax.experimental import pallas as pl
from jax.experimental.pallas import tpu as pltpu

PRIMITIVES = ['none', 'max_pool_3x3', 'avg_pool_3x3', 'skip_connect',
              'sep_conv_3x3', 'sep_conv_5x5', 'dil_conv_3x3', 'dil_conv_5x5']

LANE = 128


def _round_up(x, m):
    return ((x + m - 1) // m) * m


def _padded_k(K):
    """Contraction-dim padding rule shared by host weight prep and the kernel."""
    return K if K <= 512 else _round_up(K, 512)


# ----------------------------------------------------------------------------
# Fused Pallas kernels
# ----------------------------------------------------------------------------
@partial(jax.jit, static_argnames=("relu_in", "relu_out"))
def matmul_affine(a, w, ss, *, relu_in, relu_out):
    """relu_out( relu_in(a) @ w * scale + shift ).

    a  : (M, K)  f32 activations (zero-padded to w.shape[0] here if needed)
    w  : (Kp, Np) bf16 weight, Np a multiple of 128 (lane-dense output)
    ss : (2, Np) f32 folded BN scale / shift
    Grid: (M tiles  [parallel], K tiles [arbitrary]) with an f32 VMEM accumulator.
    """
    M, K = a.shape
    Kp, Np = w.shape
    if Kp != K:
        a = jnp.pad(a, ((0, 0), (0, Kp - K)))
    TM = 256
    Mp = _round_up(max(M, 8), 8)
    if Mp > TM:
        Mp = _round_up(Mp, TM)
        tm = TM
    else:
        tm = Mp
    if Mp != M:
        a = jnp.pad(a, ((0, Mp - M), (0, 0)))
    tk = Kp if Kp <= 512 else 512
    assert Kp % tk == 0
    nm, nk = Mp // tm, Kp // tk

    def kernel(a_ref, w_ref, ss_ref, o_ref, acc_ref):
        @pl.when(pl.program_id(1) == 0)
        def _():
            acc_ref[...] = jnp.zeros_like(acc_ref)

        x = a_ref[...]
        if relu_in:
            x = jnp.maximum(x, 0.0)                 # f32 VPU (v5e has no bf16 VPU)
        acc_ref[...] += jnp.dot(x.astype(jnp.bfloat16), w_ref[...],
                                preferred_element_type=jnp.float32)

        @pl.when(pl.program_id(1) == pl.num_programs(1) - 1)
        def _():
            y = acc_ref[...] * ss_ref[0:1, :] + ss_ref[1:2, :]
            if relu_out:
                y = jnp.maximum(y, 0.0)
            o_ref[...] = y

    out = pl.pallas_call(
        kernel,
        out_shape=jax.ShapeDtypeStruct((Mp, Np), jnp.float32),
        grid=(nm, nk),
        in_specs=[pl.BlockSpec((tm, tk), lambda i, k: (i, k)),
                  pl.BlockSpec((tk, Np), lambda i, k: (k, 0)),
                  pl.BlockSpec((2, Np), lambda i, k: (0, 0))],
        out_specs=pl.BlockSpec((tm, Np), lambda i, k: (i, 0)),
        scratch_shapes=[pltpu.VMEM((tm, Np), jnp.float32)],
        compiler_params=pltpu.CompilerParams(
            dimension_semantics=("parallel", "arbitrary")),
    )(a, w, ss)
    return out[:M]


@partial(jax.jit, static_argnames=("k", "stride", "pad", "relu_in", "relu_out"))
def conv2d_bn_act(x, w, ss, *, k, stride, pad, relu_in, relu_out):
    """Dense conv via im2col + the fused matmul/affine kernel. x: NHWC (true channels)."""
    N, H, W, Cin = x.shape
    Ho = (H + 2 * pad - k) // stride + 1
    Wo = (W + 2 * pad - k) // stride + 1
    xp = jnp.pad(x, ((0, 0), (pad, pad), (pad, pad), (0, 0)))
    cols = []
    for dy in range(k):
        for dx in range(k):
            cols.append(xp[:, dy: dy + (Ho - 1) * stride + 1: stride,
                              dx: dx + (Wo - 1) * stride + 1: stride, :])
    patches = jnp.concatenate(cols, axis=-1).reshape(N * Ho * Wo, k * k * Cin)
    out = matmul_affine(patches, w, ss, relu_in=relu_in, relu_out=relu_out)
    return out.reshape(N, Ho, Wo, w.shape[1])


@partial(jax.jit, static_argnames=("k", "dil"))
def sepdil_unit(x, w_dw, w_pw, ss, *, k, dil):
    """One SepConv/DilConv stage fused in a single kernel (grid over batch):
       ReLU -> depthwise kxk (dilated) -> pointwise 1x1 -> BatchNorm.

       x    : (N, H, W, Cp)  channel-padded state (padded lanes are zero)
       w_dw : (k*k, 1, W*Cp) f32 per-tap depthwise weights tiled over W
       w_pw : (Cp, Cp)       bf16 dense pointwise weight (no kron)
       ss   : (2, Cp)        f32 BN scale/shift (zero on padded lanes)
    """
    N, H, W, Cp = x.shape
    pad = dil * (k - 1) // 2
    Hp, Wp = H + 2 * pad, W + 2 * pad
    WCp = W * Cp
    xp = jnp.pad(x, ((0, 0), (pad, pad), (pad, pad), (0, 0))).reshape(N, Hp, Wp * Cp)

    def kernel(x_ref, wdw_ref, wpw_ref, ss_ref, o_ref):
        xv = jnp.maximum(x_ref[...], 0.0)                  # ReLU once on padded block
        acc = xv[0:H, 0:WCp] * wdw_ref[0]
        for dy in range(k):
            for dx in range(k):
                if dy == 0 and dx == 0:
                    continue
                tap = xv[dy * dil: dy * dil + H,
                         dx * dil * Cp: dx * dil * Cp + WCp]
                acc = acc + tap * wdw_ref[dy * k + dx]
        wpw = wpw_ref[...]
        scale, shift = ss_ref[0:1, :], ss_ref[1:2, :]
        # TODO(synk): for large W use a (N*H*W, Cp) layout with one matmul instead
        #             of this unrolled per-128-lane-column loop.
        for wc in range(W):
            blk = acc[:, wc * Cp:(wc + 1) * Cp].astype(jnp.bfloat16)
            y = jnp.dot(blk, wpw, preferred_element_type=jnp.float32)
            o_ref[:, wc * Cp:(wc + 1) * Cp] = y * scale + shift

    out = pl.pallas_call(
        kernel,
        out_shape=jax.ShapeDtypeStruct((N, H, WCp), jnp.float32),
        grid=(N,),
        in_specs=[pl.BlockSpec((None, Hp, Wp * Cp), lambda n: (n, 0, 0)),
                  pl.BlockSpec((k * k, 1, WCp), lambda n: (0, 0, 0)),
                  pl.BlockSpec((Cp, Cp), lambda n: (0, 0)),
                  pl.BlockSpec((2, Cp), lambda n: (0, 0))],
        out_specs=pl.BlockSpec((None, H, WCp), lambda n: (n, 0, 0)),
        compiler_params=pltpu.CompilerParams(dimension_semantics=("parallel",)),
    )(xp, w_dw, w_pw, ss)
    return out.reshape(N, H, W, Cp)


@jax.jit
def max_pool_3x3(x):
    """3x3 stride-1 max pool on a channel-padded state; taps sliced in-kernel."""
    N, H, W, Cp = x.shape
    WCp = W * Cp
    xp = jnp.pad(x, ((0, 0), (1, 1), (1, 1), (0, 0)),
                 constant_values=-jnp.inf).reshape(N, H + 2, (W + 2) * Cp)

    def kernel(x_ref, o_ref):
        xv = x_ref[...]
        acc = xv[0:H, 0:WCp]
        for dy in range(3):
            for dx in range(3):
                if dy == 0 and dx == 0:
                    continue
                acc = jnp.maximum(acc, xv[dy:dy + H, dx * Cp: dx * Cp + WCp])
        o_ref[...] = acc

    out = pl.pallas_call(
        kernel,
        out_shape=jax.ShapeDtypeStruct((N, H, WCp), jnp.float32),
        grid=(N,),
        in_specs=[pl.BlockSpec((None, H + 2, (W + 2) * Cp), lambda n: (n, 0, 0))],
        out_specs=pl.BlockSpec((None, H, WCp), lambda n: (n, 0, 0)),
        compiler_params=pltpu.CompilerParams(dimension_semantics=("parallel",)),
    )(xp)
    return out.reshape(N, H, W, Cp)


@jax.jit
def avg_pool_3x3(x, inv_cnt):
    """3x3 stride-1 avg pool (count_include_pad=False, DARTS convention)."""
    N, H, W, Cp = x.shape
    WCp = W * Cp
    xp = jnp.pad(x, ((0, 0), (1, 1), (1, 1), (0, 0))).reshape(N, H + 2, (W + 2) * Cp)

    def kernel(x_ref, inv_ref, o_ref):
        xv = x_ref[...]
        acc = xv[0:H, 0:WCp]
        for dy in range(3):
            for dx in range(3):
                if dy == 0 and dx == 0:
                    continue
                acc = acc + xv[dy:dy + H, dx * Cp: dx * Cp + WCp]
        o_ref[...] = acc * inv_ref[...]

    out = pl.pallas_call(
        kernel,
        out_shape=jax.ShapeDtypeStruct((N, H, WCp), jnp.float32),
        grid=(N,),
        in_specs=[pl.BlockSpec((None, H + 2, (W + 2) * Cp), lambda n: (n, 0, 0)),
                  pl.BlockSpec((H, WCp), lambda n: (0, 0))],
        out_specs=pl.BlockSpec((None, H, WCp), lambda n: (n, 0, 0)),
        compiler_params=pltpu.CompilerParams(dimension_semantics=("parallel",)),
    )(xp, inv_cnt)
    return out.reshape(N, H, W, Cp)


@jax.jit
def _resize_apply(x3, A, B):
    """Per-sample bilinear resize: out[n] = A @ x3[n] @ B (grid over batch)."""
    N, H, WC = x3.shape
    Ho, WoC = A.shape[0], B.shape[1]

    def kernel(x_ref, a_ref, b_ref, o_ref):
        t = jnp.dot(a_ref[...], x_ref[...], preferred_element_type=jnp.float32)
        o_ref[...] = jnp.dot(t, b_ref[...], preferred_element_type=jnp.float32)

    return pl.pallas_call(
        kernel,
        out_shape=jax.ShapeDtypeStruct((N, Ho, WoC), jnp.float32),
        grid=(N,),
        in_specs=[pl.BlockSpec((None, H, WC), lambda n: (n, 0, 0)),
                  pl.BlockSpec((Ho, H), lambda n: (0, 0)),
                  pl.BlockSpec((WC, WoC), lambda n: (0, 0))],
        out_specs=pl.BlockSpec((None, Ho, WoC), lambda n: (n, 0, 0)),
        compiler_params=pltpu.CompilerParams(dimension_semantics=("parallel",)),
    )(x3, A, B)


# ----------------------------------------------------------------------------
# Host-side helpers (interpolation matrices, pool counts, parameters)
# ----------------------------------------------------------------------------
def _interp_matrix_np(out_size, in_size):
    """Bilinear (align_corners=True) 1-D interpolation matrix (out, in)."""
    idx = np.arange(out_size, dtype=np.float64)
    f = idx * (in_size - 1) / (out_size - 1) if out_size > 1 else np.zeros(out_size)
    i0 = np.clip(np.floor(f).astype(np.int64), 0, in_size - 1)
    i1 = np.minimum(i0 + 1, in_size - 1)
    w1 = (f - i0).astype(np.float32)
    M = np.zeros((out_size, in_size), dtype=np.float32)
    M[np.arange(out_size), i0] += 1.0 - w1
    M[np.arange(out_size), i1] += w1
    return M


@lru_cache(maxsize=None)
def _interp_A(Ho, Hi):
    return jnp.asarray(_interp_matrix_np(Ho, Hi))


@lru_cache(maxsize=None)
def _interp_B(Wo, Wi, C):
    return jnp.asarray(np.kron(_interp_matrix_np(Wo, Wi).T,
                               np.eye(C, dtype=np.float32)))


def bilinear_resize(x, size_hw):
    """F.interpolate(mode='bilinear', align_corners=True); x has true channels."""
    N, H, W, C = x.shape
    Ho, Wo = int(size_hw[0]), int(size_hw[1])
    if (Ho, Wo) == (H, W):
        return x
    A = _interp_A(Ho, H)
    B = _interp_B(Wo, W, C)
    y = _resize_apply(x.reshape(N, H, W * C), A, B)
    return y.reshape(N, Ho, Wo, C)


@lru_cache(maxsize=None)
def _avg_inv_count(H, W, Cp):
    cnt = np.zeros((H, W), np.float32)
    for h in range(H):
        for w in range(W):
            rc = min(H - 1, h + 1) - max(0, h - 1) + 1
            cc = min(W - 1, w + 1) - max(0, w - 1) + 1
            cnt[h, w] = rc * cc
    inv = (1.0 / cnt)[:, :, None].repeat(Cp, axis=2).reshape(H, W * Cp)
    return jnp.asarray(inv.astype(np.float32))


def scale_dimension(dim, scale):
    return int((float(dim) - 1.0) * scale + 1.0) if dim % 2 == 1 else int(float(dim) * scale)


class ParamStore:
    """Deterministic host-side (numpy) parameter factory, consumed in forward order."""

    def __init__(self, seed=0):
        self._rng = np.random.RandomState(seed)

    def normal(self, shape):
        return self._rng.randn(*shape).astype(np.float32)

    def bn_scale_shift(self, C, affine=True, eps=1e-5):
        # Eval-mode BatchNorm with synthetic running stats (see TODO in header).
        gamma = (1.0 + 0.1 * self.normal((C,))) if affine else np.ones(C, np.float32)
        beta = (0.05 * self.normal((C,))) if affine else np.zeros(C, np.float32)
        mean = 0.05 * self.normal((C,))
        var = 1.0 + 0.1 * np.abs(self.normal((C,)))
        scale = (gamma / np.sqrt(var + eps)).astype(np.float32)
        shift = (beta - mean * scale).astype(np.float32)
        return scale, shift


# ----------------------------------------------------------------------------
# NN building blocks (weights padded host-side: lane-dense, bf16 MXU operands)
# ----------------------------------------------------------------------------
def conv_naive_bn(P, x, cout, k, stride, pad):
    """nn.Conv2d(bias=True) + NaiveBN (= BatchNorm2d + ReLU), one fused kernel."""
    Cin = x.shape[-1]
    K = k * k * Cin
    Kp, Np = _padded_k(K), _round_up(cout, LANE)
    w = (P.normal((K, cout)) / math.sqrt(K)).astype(np.float32)
    b = (0.01 * P.normal((cout,))).astype(np.float32)
    scale, shift = P.bn_scale_shift(cout, affine=True)
    shift = (shift + scale * b).astype(np.float32)       # fold conv bias into BN shift
    w_p = np.zeros((Kp, Np), np.float32)
    w_p[:K, :cout] = w
    ss_p = np.zeros((2, Np), np.float32)
    ss_p[0, :cout], ss_p[1, :cout] = scale, shift
    y = conv2d_bn_act(x, jnp.asarray(w_p, dtype=jnp.bfloat16), jnp.asarray(ss_p),
                      k=k, stride=stride, pad=pad, relu_in=False, relu_out=True)
    return y[..., :cout]                                  # public tensors: true channels


def relu_conv_bn(P, x, cout):
    """ReLUConvBN (1x1). Returns a channel-PADDED tensor (padded lanes are zero)."""
    N, H, W, Cin = x.shape
    Np = _round_up(cout, LANE)
    w = (P.normal((Cin, cout)) / math.sqrt(Cin)).astype(np.float32)
    scale, shift = P.bn_scale_shift(cout, affine=True)
    w_p = np.zeros((_padded_k(Cin), Np), np.float32)
    w_p[:Cin, :cout] = w
    ss_p = np.zeros((2, Np), np.float32)
    ss_p[0, :cout], ss_p[1, :cout] = scale, shift
    out = matmul_affine(x.reshape(N * H * W, Cin),
                        jnp.asarray(w_p, dtype=jnp.bfloat16), jnp.asarray(ss_p),
                        relu_in=True, relu_out=False)
    return out.reshape(N, H, W, Np)


def _sepdil_params(P, C, W, k):
    Cp = _round_up(C, LANE)
    w_dw = (P.normal((k * k, C)) / float(k * k)).astype(np.float32)
    w_pw = (P.normal((C, C)) / math.sqrt(C)).astype(np.float32)
    scale, shift = P.bn_scale_shift(C, affine=True)
    w_dw_p = np.zeros((k * k, Cp), np.float32)
    w_dw_p[:, :C] = w_dw
    w_dw_t = np.tile(w_dw_p, (1, W)).reshape(k * k, 1, W * Cp)
    w_pw_p = np.zeros((Cp, Cp), np.float32)
    w_pw_p[:C, :C] = w_pw
    ss_p = np.zeros((2, Cp), np.float32)
    ss_p[0, :C], ss_p[1, :C] = scale, shift
    return (jnp.asarray(w_dw_t), jnp.asarray(w_pw_p, dtype=jnp.bfloat16),
            jnp.asarray(ss_p))


def sep_conv(P, x, c, k):
    W = x.shape[2]
    for _ in range(2):
        w_dw, w_pw, ss = _sepdil_params(P, c, W, k)
        x = sepdil_unit(x, w_dw, w_pw, ss, k=k, dil=1)
    return x


def dil_conv(P, x, c, k):
    W = x.shape[2]
    w_dw, w_pw, ss = _sepdil_params(P, c, W, k)
    return sepdil_unit(x, w_dw, w_pw, ss, k=k, dil=2)


def apply_op(P, primitive, x, c):
    if primitive == 'none':
        return jnp.zeros_like(x)
    if primitive == 'skip_connect':
        return x                                         # stride == 1 -> Identity
    if primitive == 'max_pool_3x3':
        return max_pool_3x3(x)
    if primitive == 'avg_pool_3x3':
        N, H, W, Cp = x.shape
        return avg_pool_3x3(x, _avg_inv_count(H, W, Cp))
    if primitive == 'sep_conv_3x3':
        return sep_conv(P, x, c, 3)
    if primitive == 'sep_conv_5x5':
        return sep_conv(P, x, c, 5)
    if primitive == 'dil_conv_3x3':
        return dil_conv(P, x, c, 3)
    if primitive == 'dil_conv_5x5':
        return dil_conv(P, x, c, 5)
    raise ValueError(primitive)


# ----------------------------------------------------------------------------
# Cell and whole-model forward
# ----------------------------------------------------------------------------
def cell_forward(P, prev_prev, prev, steps, block_multiplier, C_out, downup, cell_arch):
    s0, s1 = prev_prev, prev
    if downup != 0:
        scale = 0.5 if downup == -1 else 2.0
        h = scale_dimension(s1.shape[1], scale)
        w = scale_dimension(s1.shape[2], scale)
        s1 = bilinear_resize(s1, (h, w))
    if s0.shape[1] != s1.shape[1] or s0.shape[2] != s1.shape[2]:
        s0 = bilinear_resize(s0, (s1.shape[1], s1.shape[2]))
    Cp = _round_up(C_out, LANE)
    if s0.shape[3] != C_out:
        s0 = relu_conv_bn(P, s0, C_out)                  # pre_preprocess (padded out)
    else:
        s0 = jnp.pad(s0, ((0, 0), (0, 0), (0, 0), (0, Cp - C_out)))
    s1 = relu_conv_bn(P, s1, C_out)                      # preprocess (padded out)

    states = [s0, s1]
    branch_set = set(int(r[0]) for r in cell_arch)
    offset = 0
    ops_index = 0
    for _ in range(steps):
        new_states = []
        for j, h_st in enumerate(states):
            branch_index = offset + j
            if branch_index in branch_set:
                primitive = PRIMITIVES[int(cell_arch[ops_index][1])]
                new_states.append(apply_op(P, primitive, h_st, C_out))
                ops_index += 1
        s = new_states[0]
        for ns in new_states[1:]:
            s = s + ns
        offset += len(states)
        states.append(s)
    return jnp.concatenate([st[..., :C_out] for st in states[-block_multiplier:]],
                           axis=-1)


def model_forward(x_nchw, cell_arch, filter_multiplier=4, block_multiplier=5,
                  steps=5, initial_fm=16):
    P = ParamStore(0)
    fm, bm = filter_multiplier, block_multiplier
    d = {0: 1, 1: 2, 2: 4, 3: 8}

    x = jnp.transpose(x_nchw, (0, 2, 3, 1)).astype(jnp.float32)      # NCHW -> NHWC
    half = initial_fm // 2

    stem = conv_naive_bn(P, x, half, 3, 2, 1)                        # stem0
    stem0 = conv_naive_bn(P, stem, half, 3, 1, 1)                    # stem1
    stem1 = conv_naive_bn(P, stem0, initial_fm, 3, 2, 1)             # stem2

    def cell(pp, p, lvl, downup):
        return cell_forward(P, pp, p, steps, bm, fm * d[lvl], downup, cell_arch)

    def combine(a, b):
        y = jnp.concatenate([a, b], axis=-1)
        return conv_naive_bn(P, y, fm * d[2] * bm, 3, 1, 1)

    x_0_0 = cell(stem0, stem1, 0, 0)
    x_0_1 = cell(stem, stem1, 1, -1)
    x_1_0 = cell(stem1, x_0_1, 0, 1)
    x_1_1 = cell(stem1, x_0_0, 1, -1)
    x_2_1 = cell(x_0_1, x_1_0, 1, -1)
    x_2_2 = cell(x_0_0, x_1_1, 2, -1)
    x_3_2_0 = cell(x_1_0, x_2_1, 2, -1)
    x_3_2_1 = cell(x_1_1, x_2_2, 2, 0)
    x_3_2 = combine(x_3_2_0, x_3_2_1)
    x_4_1 = cell(x_2_1, x_3_2, 1, 1)
    x_4_2 = cell(x_2_1, x_3_2, 2, 0)
    x_5_1 = cell(x_3_2, x_4_1, 1, 0)
    x_5_2_0 = cell(x_3_2, x_4_1, 2, -1)
    x_5_2_1 = cell(x_3_2, x_4_2, 2, 0)
    x_5_2 = combine(x_5_2_0, x_5_2_1)
    x_6_1 = cell(x_4_1, x_5_2, 1, 1)
    x_6_2_0 = cell(x_4_1, x_5_1, 2, -1)
    x_6_2_1 = cell(x_4_1, x_5_2, 2, 0)
    x_6_2 = combine(x_6_2_0, x_6_2_1)
    x_6_3 = cell(x_4_1, x_5_2, 3, -1)
    x_7_2_0 = cell(x_5_2, x_6_1, 2, -1)
    x_7_2_1 = cell(x_5_2, x_6_3, 2, 1)
    x_7_2 = combine(x_7_2_0, x_7_2_1)
    x_7_3 = cell(x_5_1, x_6_2, 3, -1)
    x_8_1 = cell(x_6_1, x_7_2, 1, 1)
    x_8_2 = cell(x_6_2, x_7_3, 2, 1)
    x_9_0 = cell(x_7_2, x_8_1, 0, 1)
    x_9_2 = cell(x_7_3, x_8_2, 2, 0)
    x_10_1 = cell(x_8_1, x_9_0, 1, -1)
    x_10_3 = cell(x_8_2, x_9_2, 3, -1)
    x_11_0 = cell(x_9_0, x_10_1, 0, 1)
    x_11_1 = cell(x_9_0, x_10_1, 1, 0)
    x_11_2 = cell(x_9_0, x_10_1, 2, -1)
    x_11_3 = cell(x_9_2, x_10_3, 3, 0)

    to_nchw = lambda t: jnp.transpose(t, (0, 3, 1, 2))
    return [to_nchw(x_11_0), to_nchw(x_11_1), to_nchw(x_11_2), to_nchw(x_11_3)]


# ----------------------------------------------------------------------------
# main
# ----------------------------------------------------------------------------
if __name__ == "__main__":
    # Genotype: 2 selected edges per step, rows sorted by branch index.
    cell_arch = np.array(
        [[0, 3], [1, 4],      # skip_connect, sep_conv_3x3
         [2, 1], [4, 3],      # max_pool_3x3, skip_connect
         [5, 3], [8, 2],      # skip_connect, avg_pool_3x3
         [9, 6], [11, 3],     # dil_conv_3x3, skip_connect
         [14, 3], [15, 3]],   # skip_connect, skip_connect
        dtype=np.int64)

    FM, BM, STEPS, INITIAL_FM = 4, 5, 5, 16
    key = jax.random.PRNGKey(0)
    x = jax.random.normal(key, (2, 4, 16, 16), jnp.float32)   # NCHW, like PyTorch

    outs = model_forward(x, cell_arch, filter_multiplier=FM, block_multiplier=BM,
                         steps=STEPS, initial_fm=INITIAL_FM)
    outs = [jax.block_until_ready(o) for o in outs]

    # With a 16x16 input the reference network's levels 1-3 collapse to 1x1 spatial
    # (scale_dimension(1, s) == 1), exactly as the PyTorch module would.
    expected = [(2, 20, 1, 1), (2, 40, 1, 1), (2, 80, 1, 1), (2, 160, 1, 1)]
    assert [tuple(o.shape) for o in outs] == expected, [tuple(o.shape) for o in outs]
    assert all(bool(jnp.all(jnp.isfinite(o))) for o in outs)
    print("KERNEL_OK")
</pallas_src>

<mosaic_0001>
module attributes {stable_mosaic.version = 11 : i64} {
  func.func @kernel(%arg0: i32, %arg1: i32, %arg2: memref<128x36xf32, #tpu.memory_space<vmem>>, %arg3: memref<36x128xbf16, #tpu.memory_space<vmem>>, %arg4: memref<2x128xf32, #tpu.memory_space<vmem>>, %arg5: memref<128x128xf32, #tpu.memory_space<vmem>>, %arg6: memref<128x128xf32, #tpu.memory_space<vmem>>) attributes {dimension_semantics = [#tpu.dimension_semantics<parallel>, #tpu.dimension_semantics<arbitrary>], iteration_bounds = array<i64: 1, 1>, scalar_prefetch = 0 : i64, scratch_operands = 1 : i64, tpu.core_type = #tpu.core_type<tc>, window_params = [{transform_indices = @transform_0, window_bounds = array<i64: 128, 36>}, {transform_indices = @transform_1, window_bounds = array<i64: 36, 128>}, {pipeline_mode = #tpu.pipeline_mode<synchronous>, transform_indices = @transform_2, window_bounds = array<i64: 2, 128>}, {transform_indices = @transform_3, window_bounds = array<i64: 128, 128>}]} {
    %c0_i32 = arith.constant 0 : i32
    %0 = arith.cmpi eq, %arg1, %c0_i32 : i32
    %1 = arith.extui %0 : i1 to i32
    %c0_i32_0 = arith.constant 0 : i32
    %2 = arith.cmpi ne, %1, %c0_i32_0 : i32
    scf.if %2 {
      %cst_10 = arith.constant 0.000000e+00 : f32
      %13 = vector.broadcast %cst_10 : f32 to vector<128x128xf32>
      %c0_11 = arith.constant 0 : index
      %c0_12 = arith.constant 0 : index
      %14 = vector.load %arg6[%c0_11, %c0_12] : memref<128x128xf32, #tpu.memory_space<vmem>>, vector<128x128xf32>
      tpu.vector_store %arg6[%c0_11, %c0_12], %13 {strides = array<i32>} : memref<128x128xf32, #tpu.memory_space<vmem>>, vector<128x128xf32>,
    } else {
    }
    %c0 = arith.constant 0 : index
    %c0_1 = arith.constant 0 : index
    %3 = vector.load %arg2[%c0, %c0_1] : memref<128x36xf32, #tpu.memory_space<vmem>>, vector<128x36xf32>
    %c0_2 = arith.constant 0 : index
    %c0_3 = arith.constant 0 : index
    %4 = vector.load %arg6[%c0_2, %c0_3] : memref<128x128xf32, #tpu.memory_space<vmem>>, vector<128x128xf32>
    %5 = arith.truncf %3 : vector<128x36xf32> to vector<128x36xbf16>
    %c0_4 = arith.constant 0 : index
    %c0_5 = arith.constant 0 : index
    %6 = vector.load %arg3[%c0_4, %c0_5] : memref<36x128xbf16, #tpu.memory_space<vmem>>, vector<36x128xbf16>
    %cst = arith.constant dense<0.000000e+00> : vector<128x128xf32>
    %7 = tpu.matmul %5, %6, %cst {dimension_numbers = #tpu.dot_dimension_numbers<[1], [0], [0], [1], [0, 0, 1, 1], [], []>} : vector<128x36xbf16>, vector<36x128xbf16>, vector<128x128xf32> -> vector<128x128xf32>
    %8 = arith.addf %4, %7 : vector<128x128xf32>
    %c0_6 = arith.constant 0 : index
    %c0_7 = arith.constant 0 : index
    %9 = vector.load %arg6[%c0_6, %c0_7] : memref<128x128xf32, #tpu.memory_space<vmem>>, vector<128x128xf32>
    tpu.vector_store %arg6[%c0_6, %c0_7], %8 {strides = array<i32>} : memref<128x128xf32, #tpu.memory_space<vmem>>, vector<128x128xf32>,
    %c0_i32_8 = arith.constant 0 : i32
    %10 = arith.cmpi eq, %arg1, %c0_i32_8 : i32
    %11 = arith.extui %10 : i1 to i32
    %c0_i32_9 = arith.constant 0 : i32
    %12 = arith.cmpi ne, %11, %c0_i32_9 : i32
    scf.if %12 {
      %c0_10 = arith.constant 0 : index
      %c0_11 = arith.constant 0 : index
      %13 = vector.load %arg6[%c0_10, %c0_11] : memref<128x128xf32, #tpu.memory_space<vmem>>, vector<128x128xf32>
      %c0_12 = arith.constant 0 : index
      %c0_13 = arith.constant 0 : index
      %14 = vector.load %arg4[%c0_12, %c0_13] : memref<2x128xf32, #tpu.memory_space<vmem>>, vector<1x128xf32>
      %15 = vector.broadcast %14 : vector<1x128xf32> to vector<128x128xf32>
      %16 = arith.mulf %13, %15 : vector<128x128xf32>
      %c1 = arith.constant 1 : index
      %c0_14 = arith.constant 0 : index
      %17 = vector.load %arg4[%c1, %c0_14] : memref<2x128xf32, #tpu.memory_space<vmem>>, vector<1x128xf32>
      %18 = vector.broadcast %17 : vector<1x128xf32> to vector<128x128xf32>
      %19 = arith.addf %16, %18 : vector<128x128xf32>
      %cst_15 = arith.constant 0.000000e+00 : f32
      %20 = vector.broadcast %cst_15 : f32 to vector<128x128xf32>
      %21 = arith.maximumf %19, %20 : vector<128x128xf32>
      %c0_16 = arith.constant 0 : index
      %c0_17 = arith.constant 0 : index
      %22 = vector.load %arg5[%c0_16, %c0_17] : memref<128x128xf32, #tpu.memory_space<vmem>>, vector<128x128xf32>
      tpu.vector_store %arg5[%c0_16, %c0_17], %21 {strides = array<i32>} : memref<128x128xf32, #tpu.memory_space<vmem>>, vector<128x128xf32>,
    } else {
    }
    return
  }
  func.func @transform_0(%arg0: i32, %arg1: i32) -> (i32, i32) {
    %c0_i32 = arith.constant 0 : i32
    return %arg0, %arg1 : i32, i32
  }
  func.func @transform_1(%arg0: i32, %arg1: i32) -> (i32, i32) {
    %c0_i32 = arith.constant 0 : i32
    %c0_i32_0 = arith.constant 0 : i32
    return %arg1, %c0_i32 : i32, i32
  }
  func.func @transform_2(%arg0: i32, %arg1: i32) -> (i32, i32) {
    %c0_i32 = arith.constant 0 : i32
    %c0_i32_0 = arith.constant 0 : i32
    %c0_i32_1 = arith.constant 0 : i32
    return %c0_i32, %c0_i32_0 : i32, i32
  }
  func.func @transform_3(%arg0: i32, %arg1: i32) -> (i32, i32) {
    %c0_i32 = arith.constant 0 : i32
    %c0_i32_0 = arith.constant 0 : i32
    return %arg0, %c0_i32 : i32, i32
  }
}

</mosaic_0001>

<bundles_post_ra>
// kernel: matmul_affine.1
= control target key start
LH: loop header
LB: loop body
LE: loop exit
PB: predicated region body
PF: predicated region fallthrough
CT: control target
= control target key end

     0   :  { %vm121_vm0 = vcmask 1041408   ;;  %s502_s0 = inlined_call_operand.vmem [shape: f32[128,36], index: 0, kind: input, shape index: {}]   ;;  %s503_s1 = inlined_call_operand.vmem [shape: bf16[36,128], index: 1, kind: input, shape index: {}]   ;;  %s504_s2 = inlined_call_operand.vmem [shape: f32[2,128], index: 2, kind: input, shape index: {}]   ;;  %s505_s3 = inlined_call_operand.hbm [shape: f32[128,128], index: 3, kind: output, shape index: {}]  }
   0x1   :  { %v80_v0 = vld [vmem:[%s503_s1 + $0x10] sm:$0x3]  ;;  %v328_v4 = vld [vmem:[%s503_s1 + $0x8] sm:$0xff] }
   0x2   :  { %v90_v1 = vunpack.c.l.b16 %v80_v0 }
   0x4   :  { %v93_v2 = vpack.c.b16 %v90_v1, %v90_v1 }
   0x6   :  { %v123_v3 = vsel %vm121_vm0, %v93_v2, 0 }
   0x7   :  { %130 = vmatpush.bf16.msra.mxu0 %v123_v3  ;;  %329 = vmatpush.bf16.msra.mxu1 %v123_v3 }
   0x8   :  { %330 = vmatpush.bf16.msra.mxu2 %v123_v3  ;;  %331 = vmatpush.bf16.msra.mxu3 %v123_v3 }
   0x9   :  { %8 = vsyncpa [#allocation4], 0  ;;  %v327_v5 = vld [vmem:[%s503_s1] sm:$0xff]  ;;  %v37_v7 = vld [vmem:[%s502_s0 + $0x8] sm:$0xff]  ;;  %vm96_vm1 = vcmask 293888   ;;  %s299_s27 = sshll.u32 %s505_s3, 4  ;;  %s300_s27 = int_to_ptr.hbm [resolvable:$true] %s299_s27 }
   0xa   :  { %v36_v6 = vld [vmem:[%s502_s0] sm:$0xff]  ;;  %v41_v9 = vld [vmem:[%s502_s0 + $0x28] sm:$0xff]  ;;  %v38_v18 = vld [vmem:[%s502_s0 + $0x10] sm:$0xff]  ;;  %s370_s28 = smov 128   ;;  %s371_s29 = smov 8  }
   0xb   :  { %131 = vmatpush.bf16.msra.mxu0 %v328_v4  ;;  %332 = vmatpush.bf16.msra.mxu1 %v328_v4  ;;  %v40_v8 = vld [vmem:[%s502_s0 + $0x20] sm:$0xff]  ;;  %v45_v11 = vld [vmem:[%s502_s0 + $0x48] sm:$0xff]  ;;  %v68_v14 = vpack.c.bf16 %v37_v7, %v36_v6  ;;  %v39_v19 = vld [vmem:[%s502_s0 + $0x18] sm:$0xff] }
   0xc   :  { %v44_v10 = vld [vmem:[%s502_s0 + $0x40] sm:$0xff]  ;;  %333 = vmatpush.bf16.msra.mxu2 %v328_v4  ;;  %334 = vmatpush.bf16.msra.mxu3 %v328_v4  ;;  %v49_v13 = vld [vmem:[%s502_s0 + $0x68] sm:$0xff]  ;;  %v70_v15 = vpack.c.bf16 %v41_v9, %v40_v8  ;;  %v42_v20 = vld [vmem:[%s502_s0 + $0x30] sm:$0xff]  ;;  %v69_v26 = vpack.c.bf16 %v39_v19, %v38_v18 }
   0xd   :  { %v48_v12 = vld [vmem:[%s502_s0 + $0x60] sm:$0xff]  ;;  %v72_v16 = vpack.c.bf16 %v45_v11, %v44_v10  ;;  %v43_v21 = vld [vmem:[%s502_s0 + $0x38] sm:$0xff]  ;;  %v46_v22 = vld [vmem:[%s502_s0 + $0x50] sm:$0xff] }
   0xe   :  { %v74_v17 = vpack.c.bf16 %v49_v13, %v48_v12  ;;  %v47_v23 = vld [vmem:[%s502_s0 + $0x58] sm:$0xff]  ;;  %v50_v24 = vld [vmem:[%s502_s0 + $0x70] sm:$0xff]  ;;  %v71_v27 = vpack.c.bf16 %v43_v21, %v42_v20  ;;  %v460_v30 = vld [vmem:[%s504_s2] ss:$0 sm:$0xff] }
   0xf   :  { %132 = vmatpush.bf16.msra.mxu0 %v327_v5  ;;  %335 = vmatpush.bf16.msra.mxu1 %v327_v5  ;;  %v51_v25 = vld [vmem:[%s502_s0 + $0x78] sm:$0xff]  ;;  %v73_v28 = vpack.c.bf16 %v47_v23, %v46_v22  ;;  %v465_v31 = vld [vmem:[%s504_s2 + $0x1] ss:$0 sm:$0xff]  ;;  %s369_s0 = smov [#allocation3]  }
  0x10   :  { %336 = vmatpush.bf16.msra.mxu2 %v327_v5  ;;  %337 = vmatpush.bf16.msra.mxu3 %v327_v5  ;;  %v75_v29 = vpack.c.bf16 %v51_v25, %v50_v24  ;;  %s297_s2 = sshll.u32 %s369_s0, 4  ;;  %s298_s2 = int_to_ptr.vmem [resolvable:$true] %s297_s2 }
  0x12   :  { %319 = vmatmul.msk.bf16.vlgmr.msra.gmra.mxu0 %vm96_vm1, %v68_v14  ;;  %321 = vmatmul.msk.bf16.vlgmr.msra.gmra.mxu1 %vm96_vm1, %v70_v15 }
  0x13   :  { %323 = vmatmul.msk.bf16.vlgmr.msra.gmra.mxu2 %vm96_vm1, %v72_v16  ;;  %325 = vmatmul.msk.bf16.vlgmr.msra.gmra.mxu3 %vm96_vm1, %v74_v17 }
  0x22   :  { %320 = vmatmul.msk.bf16.gmra.mxu0 %vm96_vm1, %v69_v26  ;;  %322 = vmatmul.msk.bf16.gmra.mxu1 %vm96_vm1, %v71_v27 }
  0x23   :  { %324 = vmatmul.msk.bf16.gmra.mxu2 %vm96_vm1, %v73_v28  ;;  %326 = vmatmul.msk.bf16.gmra.mxu3 %vm96_vm1, %v75_v29 }
  0x8f   :  { %v134_v32 = vpop.f32.mrf.mxu0  ;;  %v144_v33 = vpop.f32.mrf.mxu1 }
  0x90   :  { %v227_v34 = vmul.f32 %v460_v30, %v134_v32  ;;  %v231_v35 = vmul.f32 %v460_v30, %v144_v33 }
  0x92   :  { %v245_v36 = vadd.f32 %v465_v31, %v227_v34  ;;  %v249_v37 = vadd.f32 %v465_v31, %v231_v35 }
  0x94   :  { %v261_v38 = vmax.f32 %v245_v36, 0.0  ;;  %v265_v39 = vmax.f32 %v249_v37, 0.0 }
  0x96   :  { %277 = vst [vmem:[#allocation3] sm:$0xff] %v261_v38  ;;  %v154_v40 = vpop.f32.mrf.mxu2  ;;  %v164_v41 = vpop.f32.mrf.mxu3 }
  0x97   :  { %281 = vst [vmem:[#allocation3 + $0x20] sm:$0xff] %v265_v39  ;;  %v235_v42 = vmul.f32 %v460_v30, %v154_v40  ;;  %v239_v43 = vmul.f32 %v460_v30, %v164_v41  ;;  %v136_v44 = vpop.f32.mrf.mxu0  ;;  %v146_v45 = vpop.f32.mrf.mxu1 }
  0x98   :  { %v228_v46 = vmul.f32 %v460_v30, %v136_v44  ;;  %v232_v47 = vmul.f32 %v460_v30, %v146_v45 }
  0x99   :  { %v253_v48 = vadd.f32 %v465_v31, %v235_v42  ;;  %v257_v49 = vadd.f32 %v465_v31, %v239_v43 }
  0x9a   :  { %v246_v50 = vadd.f32 %v465_v31, %v228_v46  ;;  %v250_v51 = vadd.f32 %v465_v31, %v232_v47 }
  0x9b   :  { %v269_v52 = vmax.f32 %v253_v48, 0.0  ;;  %v273_v53 = vmax.f32 %v257_v49, 0.0 }
  0x9c   :  { %v262_v54 = vmax.f32 %v246_v50, 0.0  ;;  %v266_v55 = vmax.f32 %v250_v51, 0.0 }
  0x9d   :  { %285 = vst [vmem:[#allocation3 + $0x40] sm:$0xff] %v269_v52 }
  0x9e   :  { %289 = vst [vmem:[#allocation3 + $0x60] sm:$0xff] %v273_v53  ;;  %v156_v56 = vpop.f32.mrf.mxu2  ;;  %v166_v57 = vpop.f32.mrf.mxu3 }
  0x9f   :  { %278 = vst [vmem:[#allocation3 + $0x8] sm:$0xff] %v262_v54  ;;  %v236_v58 = vmul.f32 %v460_v30, %v156_v56  ;;  %v240_v59 = vmul.f32 %v460_v30, %v166_v57  ;;  %v139_v60 = vpop.f32.mrf.mxu0  ;;  %v149_v61 = vpop.f32.mrf.mxu1 }
  0xa0   :  { %282 = vst [vmem:[#allocation3 + $0x28] sm:$0xff] %v266_v55  ;;  %v229_v62 = vmul.f32 %v460_v30, %v139_v60  ;;  %v233_v63 = vmul.f32 %v460_v30, %v149_v61 }
  0xa1   :  { %v254_v0 = vadd.f32 %v465_v31, %v236_v58  ;;  %v258_v1 = vadd.f32 %v465_v31, %v240_v59 }
  0xa2   :  { %v247_v2 = vadd.f32 %v465_v31, %v229_v62  ;;  %v251_v3 = vadd.f32 %v465_v31, %v233_v63 }
  0xa3   :  { %v270_v4 = vmax.f32 %v254_v0, 0.0  ;;  %v274_v5 = vmax.f32 %v258_v1, 0.0 }
  0xa4   :  { %v263_v6 = vmax.f32 %v247_v2, 0.0  ;;  %v267_v7 = vmax.f32 %v251_v3, 0.0 }
  0xa5   :  { %286 = vst [vmem:[#allocation3 + $0x48] sm:$0xff] %v270_v4 }
  0xa6   :  { %290 = vst [vmem:[#allocation3 + $0x68] sm:$0xff] %v274_v5  ;;  %v159_v8 = vpop.f32.mrf.mxu2  ;;  %v169_v9 = vpop.f32.mrf.mxu3 }
  0xa7   :  { %279 = vst [vmem:[#allocation3 + $0x10] sm:$0xff] %v263_v6  ;;  %v237_v10 = vmul.f32 %v460_v30, %v159_v8  ;;  %v241_v11 = vmul.f32 %v460_v30, %v169_v9  ;;  %v141_v12 = vpop.f32.mrf.mxu0  ;;  %v151_v13 = vpop.f32.mrf.mxu1 }
  0xa8   :  { %283 = vst [vmem:[#allocation3 + $0x30] sm:$0xff] %v267_v7  ;;  %v230_v14 = vmul.f32 %v460_v30, %v141_v12  ;;  %v234_v15 = vmul.f32 %v460_v30, %v151_v13 }
  0xa9   :  { %v255_v16 = vadd.f32 %v465_v31, %v237_v10  ;;  %v259_v17 = vadd.f32 %v465_v31, %v241_v11 }
  0xaa   :  { %v248_v18 = vadd.f32 %v465_v31, %v230_v14  ;;  %v252_v19 = vadd.f32 %v465_v31, %v234_v15 }
  0xab   :  { %v271_v20 = vmax.f32 %v255_v16, 0.0  ;;  %v275_v21 = vmax.f32 %v259_v17, 0.0 }
  0xac   :  { %v264_v22 = vmax.f32 %v248_v18, 0.0  ;;  %v268_v23 = vmax.f32 %v252_v19, 0.0 }
  0xad   :  { %287 = vst [vmem:[#allocation3 + $0x50] sm:$0xff] %v271_v20 }
  0xae   :  { %291 = vst [vmem:[#allocation3 + $0x70] sm:$0xff] %v275_v21  ;;  %v161_v24 = vpop.f32.mrf.mxu2  ;;  %v171_v25 = vpop.f32.mrf.mxu3 }
  0xaf   :  { %280 = vst [vmem:[#allocation3 + $0x18] sm:$0xff] %v264_v22  ;;  %v238_v26 = vmul.f32 %v460_v30, %v161_v24  ;;  %v242_v27 = vmul.f32 %v460_v30, %v171_v25 }
  0xb0   :  { %284 = vst [vmem:[#allocation3 + $0x38] sm:$0xff] %v268_v23 }
  0xb1   :  { %v256_v28 = vadd.f32 %v465_v31, %v238_v26  ;;  %v260_v29 = vadd.f32 %v465_v31, %v242_v27 }
  0xb3   :  { %v272_v32 = vmax.f32 %v256_v28, 0.0  ;;  %v276_v33 = vmax.f32 %v260_v29, 0.0 }
  0xb5   :  { %288 = vst [vmem:[#allocation3 + $0x58] sm:$0xff] %v272_v32 }
  0xb6   :  { %292 = vst [vmem:[#allocation3 + $0x78] sm:$0xff] %v276_v33 }
  0xb7   :  { %305 = dma.vmem_to_hbm [thread:$0]  %s298_s2, 2048, %s300_s27, [#allocation4], %s370_s28, %s370_s28, %s371_s29  }
  0xb8   :  { %367 = dma.done.wait [#allocation4], 2048  }
  0xb9   :  { %368 = vsyncadd [#allocation4], 4294965248 }
  0xba   :  { %310 = vsyncpa [#allocation4], 1 }

</bundles_post_ra>
